<compile_context>
chip_gen: v5e
topology: v5e:2x2
jax: 0.10.0
libtpu: 0.0.40
codegen_flags: <defaults>
</compile_context>

<pallas_src>
import functools

import jax
import jax.numpy as jnp
from jax.experimental import pallas as pl
from jax.experimental.pallas import tpu as pltpu


def _round_up(x: int, m: int) -> int:
    return ((x + m - 1) // m) * m


def _mlp_kernel(x_ref, w1_ref, b1_ref, w2_ref, b2_ref, w3_ref, b3_ref, o_ref):
    """One batch tile of: relu(x@W1+b1) @ W2+b2 -> relu -> @ W3+b3."""
    x = x_ref[...].astype(jnp.bfloat16)                              # f32 load, bf16 cast in-kernel

    # layer1 + ReLU (f32 accumulate, bias add + ReLU on f32, recast for next MXU pass)
    h1 = jnp.dot(x, w1_ref[...], preferred_element_type=jnp.float32) + b1_ref[...]
    h1 = jnp.maximum(h1, 0.0).astype(jnp.bfloat16)

    # layer2 + ReLU
    h2 = jnp.dot(h1, w2_ref[...], preferred_element_type=jnp.float32) + b2_ref[...]
    h2 = jnp.maximum(h2, 0.0).astype(jnp.bfloat16)

    # layer3 (no activation); out block last dim == out_dim (full array dim), dense DMA
    out = jnp.dot(h2, w3_ref[...], preferred_element_type=jnp.float32) + b3_ref[...]
    o_ref[...] = out.astype(o_ref.dtype)


@functools.partial(jax.jit, static_argnames=("tile_b",))
def feedforward_nn(x, w1, b1, w2, b2, w3, b3, *, tile_b=8192):
    """Pallas forward pass of FeedForwardNN.

    x : [B, in_dim] float32
    w1: [in_dim, 64], b1: [1, 64]
    w2: [64, 64],     b2: [1, 64]
    w3: [64, out_dim],b3: [1, out_dim]
    returns [B, out_dim] float32
    """
    B, in_dim = x.shape
    hidden = w1.shape[1]
    out_dim = w3.shape[1]

    # Batch tile: multiple of 8 sublanes, large to amortize per-step overhead, but
    # capped at ~ceil(B/2) so the grid has >=2 steps (megacore sharding on v7x).
    half = _round_up(max(-(-B // 2), 8), 8)
    TB = max(min(int(tile_b), half), 8)
    TB = _round_up(TB, 8)
    grid = (pl.cdiv(B, TB),)

    # Tiny weights: cast once in the wrapper (bf16 MXU operands), biases stay f32.
    w1b = w1.astype(jnp.bfloat16)
    w2b = w2.astype(jnp.bfloat16)
    w3b = w3.astype(jnp.bfloat16)
    b1f = b1.astype(jnp.float32)
    b2f = b2.astype(jnp.float32)
    b3f = b3.astype(jnp.float32)

    # Weights/biases: full-shape blocks, constant index_map -> stay VMEM-resident.
    const = lambda shape: pl.BlockSpec(shape, lambda i: (0, 0))

    out = pl.pallas_call(
        _mlp_kernel,
        out_shape=jax.ShapeDtypeStruct((B, out_dim), jnp.float32),
        grid=grid,
        in_specs=[
            pl.BlockSpec((TB, in_dim), lambda i: (i, 0)),      # x tile (f32, cast in-kernel)
            const((in_dim, hidden)),                           # w1
            const((1, hidden)),                                # b1
            const((hidden, hidden)),                           # w2
            const((1, hidden)),                                # b2
            const((hidden, out_dim)),                          # w3 (unpadded)
            const((1, out_dim)),                               # b3 (unpadded)
        ],
        out_specs=pl.BlockSpec((TB, out_dim), lambda i: (i, 0)),
        compiler_params=pltpu.CompilerParams(
            dimension_semantics=("parallel",),                 # megacore-shard batch axis
            vmem_limit_bytes=32 * 1024 * 1024,                 # safe on v7x's 64 MiB VMEM
        ),
    )(x, w1b, b1f, w2b, b2f, w3b, b3f)

    return out


def init_params(key, in_dim, out_dim):
    """Deterministic PyTorch-style Linear init: U(-1/sqrt(fan_in), 1/sqrt(fan_in))."""
    keys = jax.random.split(key, 6)

    def linear(kw, kb, fan_in, fan_out):
        bound = 1.0 / jnp.sqrt(float(fan_in))
        w = jax.random.uniform(kw, (fan_in, fan_out), jnp.float32, -bound, bound)
        b = jax.random.uniform(kb, (1, fan_out), jnp.float32, -bound, bound)
        return w, b

    w1, b1 = linear(keys[0], keys[1], in_dim, 64)
    w2, b2 = linear(keys[2], keys[3], 64, 64)
    w3, b3 = linear(keys[4], keys[5], 64, out_dim)
    return w1, b1, w2, b2, w3, b3


def reference_forward_f32(x, w1, b1, w2, b2, w3, b3):
    """Pure-f32 JAX reference (loose comparison; kernel uses bf16 operands)."""
    h1 = jax.nn.relu(x @ w1 + b1)
    h2 = jax.nn.relu(h1 @ w2 + b2)
    return h2 @ w3 + b3


def reference_forward_bf16(x, w1, b1, w2, b2, w3, b3):
    """JAX reference matching the kernel's bf16-operand / f32-accumulate path."""
    bf = jnp.bfloat16
    h1 = jnp.maximum(
        jnp.dot(x.astype(bf), w1.astype(bf), preferred_element_type=jnp.float32) + b1, 0.0)
    h2 = jnp.maximum(
        jnp.dot(h1.astype(bf), w2.astype(bf), preferred_element_type=jnp.float32) + b2, 0.0)
    return jnp.dot(h2.astype(bf), w3.astype(bf), preferred_element_type=jnp.float32) + b3


if __name__ == "__main__":
    # Small PPO-like shapes: observation dim 16, action dim 4.
    # TODO(synk): dict-based feature extraction (extract_features_as_tensor) is host-side
    # Python and has no Pallas equivalent; inputs are assumed pre-extracted dense tensors.
    in_dim, out_dim = 16, 4

    key = jax.random.PRNGKey(0)
    k_x1, k_x2, k_p = jax.random.split(key, 3)
    params = init_params(k_p, in_dim, out_dim)

    # Case 1: tiny batch (single tile).
    x1 = jax.random.normal(k_x1, (8, in_dim), dtype=jnp.float32)
    out1 = jax.block_until_ready(feedforward_nn(x1, *params))
    assert out1.shape == (8, out_dim), out1.shape
    assert jnp.allclose(out1, reference_forward_bf16(x1, *params), atol=1e-3, rtol=1e-3)
    assert jnp.allclose(out1, reference_forward_f32(x1, *params), atol=5e-2, rtol=5e-2)

    # Case 2: batch not a multiple of the tile (exercises cdiv grid + masked last tile).
    x2 = jax.random.normal(k_x2, (50, in_dim), dtype=jnp.float32)
    out2 = jax.block_until_ready(feedforward_nn(x2, *params, tile_b=32))
    assert out2.shape == (50, out_dim), out2.shape
    assert jnp.allclose(out2, reference_forward_bf16(x2, *params), atol=1e-3, rtol=1e-3)
    assert jnp.allclose(out2, reference_forward_f32(x2, *params), atol=5e-2, rtol=5e-2)

    print("KERNEL_OK")
</pallas_src>

<mosaic_0001>
module attributes {stable_mosaic.version = 11 : i64} {
  func.func @_mlp_kernel(%arg0: i32, %arg1: memref<8x16xf32, #tpu.memory_space<vmem>>, %arg2: memref<16x64xbf16, #tpu.memory_space<vmem>>, %arg3: memref<1x64xf32, #tpu.memory_space<vmem>>, %arg4: memref<64x64xbf16, #tpu.memory_space<vmem>>, %arg5: memref<1x64xf32, #tpu.memory_space<vmem>>, %arg6: memref<64x4xbf16, #tpu.memory_space<vmem>>, %arg7: memref<1x4xf32, #tpu.memory_space<vmem>>, %arg8: memref<8x4xf32, #tpu.memory_space<vmem>>) attributes {dimension_semantics = [#tpu.dimension_semantics<parallel>], iteration_bounds = array<i64: 1>, scalar_prefetch = 0 : i64, scratch_operands = 0 : i64, tpu.core_type = #tpu.core_type<tc>, window_params = [{transform_indices = @transform_0, window_bounds = array<i64: 8, 16>}, {pipeline_mode = #tpu.pipeline_mode<synchronous>, transform_indices = @transform_1, window_bounds = array<i64: 16, 64>}, {pipeline_mode = #tpu.pipeline_mode<synchronous>, transform_indices = @transform_2, window_bounds = array<i64: 1, 64>}, {pipeline_mode = #tpu.pipeline_mode<synchronous>, transform_indices = @transform_3, window_bounds = array<i64: 64, 64>}, {pipeline_mode = #tpu.pipeline_mode<synchronous>, transform_indices = @transform_4, window_bounds = array<i64: 1, 64>}, {pipeline_mode = #tpu.pipeline_mode<synchronous>, transform_indices = @transform_5, window_bounds = array<i64: 64, 4>}, {pipeline_mode = #tpu.pipeline_mode<synchronous>, transform_indices = @transform_6, window_bounds = array<i64: 1, 4>}, {transform_indices = @transform_7, window_bounds = array<i64: 8, 4>}]} {
    %c0 = arith.constant 0 : index
    %c0_0 = arith.constant 0 : index
    %0 = vector.load %arg1[%c0, %c0_0] : memref<8x16xf32, #tpu.memory_space<vmem>>, vector<8x16xf32>
    %1 = arith.truncf %0 : vector<8x16xf32> to vector<8x16xbf16>
    %c0_1 = arith.constant 0 : index
    %c0_2 = arith.constant 0 : index
    %2 = vector.load %arg2[%c0_1, %c0_2] : memref<16x64xbf16, #tpu.memory_space<vmem>>, vector<16x64xbf16>
    %cst = arith.constant dense<0.000000e+00> : vector<8x64xf32>
    %3 = tpu.matmul %1, %2, %cst {dimension_numbers = #tpu.dot_dimension_numbers<[1], [0], [0], [1], [0, 0, 1, 1], [], []>} : vector<8x16xbf16>, vector<16x64xbf16>, vector<8x64xf32> -> vector<8x64xf32>
    %c0_3 = arith.constant 0 : index
    %c0_4 = arith.constant 0 : index
    %4 = vector.load %arg3[%c0_3, %c0_4] : memref<1x64xf32, #tpu.memory_space<vmem>>, vector<1x64xf32>
    %5 = vector.broadcast %4 : vector<1x64xf32> to vector<8x64xf32>
    %6 = arith.addf %3, %5 : vector<8x64xf32>
    %cst_5 = arith.constant 0.000000e+00 : f32
    %7 = vector.broadcast %cst_5 : f32 to vector<8x64xf32>
    %8 = arith.maximumf %6, %7 : vector<8x64xf32>
    %9 = arith.truncf %8 : vector<8x64xf32> to vector<8x64xbf16>
    %c0_6 = arith.constant 0 : index
    %c0_7 = arith.constant 0 : index
    %10 = vector.load %arg4[%c0_6, %c0_7] : memref<64x64xbf16, #tpu.memory_space<vmem>>, vector<64x64xbf16>
    %cst_8 = arith.constant dense<0.000000e+00> : vector<8x64xf32>
    %11 = tpu.matmul %9, %10, %cst_8 {dimension_numbers = #tpu.dot_dimension_numbers<[1], [0], [0], [1], [0, 0, 1, 1], [], []>} : vector<8x64xbf16>, vector<64x64xbf16>, vector<8x64xf32> -> vector<8x64xf32>
    %c0_9 = arith.constant 0 : index
    %c0_10 = arith.constant 0 : index
    %12 = vector.load %arg5[%c0_9, %c0_10] : memref<1x64xf32, #tpu.memory_space<vmem>>, vector<1x64xf32>
    %13 = vector.broadcast %12 : vector<1x64xf32> to vector<8x64xf32>
    %14 = arith.addf %11, %13 : vector<8x64xf32>
    %cst_11 = arith.constant 0.000000e+00 : f32
    %15 = vector.broadcast %cst_11 : f32 to vector<8x64xf32>
    %16 = arith.maximumf %14, %15 : vector<8x64xf32>
    %17 = arith.truncf %16 : vector<8x64xf32> to vector<8x64xbf16>
    %c0_12 = arith.constant 0 : index
    %c0_13 = arith.constant 0 : index
    %18 = vector.load %arg6[%c0_12, %c0_13] : memref<64x4xbf16, #tpu.memory_space<vmem>>, vector<64x4xbf16>
    %cst_14 = arith.constant dense<0.000000e+00> : vector<8x4xf32>
    %19 = tpu.matmul %17, %18, %cst_14 {dimension_numbers = #tpu.dot_dimension_numbers<[1], [0], [0], [1], [0, 0, 1, 1], [], []>} : vector<8x64xbf16>, vector<64x4xbf16>, vector<8x4xf32> -> vector<8x4xf32>
    %c0_15 = arith.constant 0 : index
    %c0_16 = arith.constant 0 : index
    %20 = vector.load %arg7[%c0_15, %c0_16] : memref<1x4xf32, #tpu.memory_space<vmem>>, vector<1x4xf32>
    %21 = vector.broadcast %20 : vector<1x4xf32> to vector<8x4xf32>
    %22 = arith.addf %19, %21 : vector<8x4xf32>
    %c0_17 = arith.constant 0 : index
    %c0_18 = arith.constant 0 : index
    %23 = vector.load %arg8[%c0_17, %c0_18] : memref<8x4xf32, #tpu.memory_space<vmem>>, vector<8x4xf32>
    tpu.vector_store %arg8[%c0_17, %c0_18], %22 {strides = array<i32>} : memref<8x4xf32, #tpu.memory_space<vmem>>, vector<8x4xf32>,
    return
  }
  func.func @transform_0(%arg0: i32) -> (i32, i32) {
    %c0_i32 = arith.constant 0 : i32
    %c0_i32_0 = arith.constant 0 : i32
    return %arg0, %c0_i32 : i32, i32
  }
  func.func @transform_1(%arg0: i32) -> (i32, i32) {
    %c0_i32 = arith.constant 0 : i32
    %c0_i32_0 = arith.constant 0 : i32
    %c0_i32_1 = arith.constant 0 : i32
    return %c0_i32, %c0_i32_0 : i32, i32
  }
  func.func @transform_2(%arg0: i32) -> (i32, i32) {
    %c0_i32 = arith.constant 0 : i32
    %c0_i32_0 = arith.constant 0 : i32
    %c0_i32_1 = arith.constant 0 : i32
    return %c0_i32, %c0_i32_0 : i32, i32
  }
  func.func @transform_3(%arg0: i32) -> (i32, i32) {
    %c0_i32 = arith.constant 0 : i32
    %c0_i32_0 = arith.constant 0 : i32
    %c0_i32_1 = arith.constant 0 : i32
    return %c0_i32, %c0_i32_0 : i32, i32
  }
  func.func @transform_4(%arg0: i32) -> (i32, i32) {
    %c0_i32 = arith.constant 0 : i32
    %c0_i32_0 = arith.constant 0 : i32
    %c0_i32_1 = arith.constant 0 : i32
    return %c0_i32, %c0_i32_0 : i32, i32
  }
  func.func @transform_5(%arg0: i32) -> (i32, i32) {
    %c0_i32 = arith.constant 0 : i32
    %c0_i32_0 = arith.constant 0 : i32
    %c0_i32_1 = arith.constant 0 : i32
    return %c0_i32, %c0_i32_0 : i32, i32
  }
  func.func @transform_6(%arg0: i32) -> (i32, i32) {
    %c0_i32 = arith.constant 0 : i32
    %c0_i32_0 = arith.constant 0 : i32
    %c0_i32_1 = arith.constant 0 : i32
    return %c0_i32, %c0_i32_0 : i32, i32
  }
  func.func @transform_7(%arg0: i32) -> (i32, i32) {
    %c0_i32 = arith.constant 0 : i32
    %c0_i32_0 = arith.constant 0 : i32
    return %arg0, %c0_i32 : i32, i32
  }
}

</mosaic_0001>

<bundles_post_ra>
// kernel: feedforward_nn.1
= control target key start
LH: loop header
LB: loop body
LE: loop exit
PB: predicated region body
PF: predicated region fallthrough
CT: control target
= control target key end

     0   :  { %vm41_vm0 = vcmask 130048   ;;  %vm96_vm1 = vcmask 523264   ;;  %vm167_vm2 = vcmask 31744   ;;  %s306_s1 = inlined_call_operand.vmem [shape: bf16[16,64], index: 1, kind: input, shape index: {}]   ;;  %s307_s0 = inlined_call_operand.vmem [shape: f32[8,16], index: 0, kind: input, shape index: {}]   ;;  %s308_s3 = inlined_call_operand.vmem [shape: bf16[64,64], index: 3, kind: input, shape index: {}]   ;;  %s309_s2 = inlined_call_operand.vmem [shape: f32[1,64], index: 2, kind: input, shape index: {}]   ;;  %s310_s4 = inlined_call_operand.vmem [shape: f32[1,64], index: 4, kind: input, shape index: {}]   ;;  %s311_s5 = inlined_call_operand.vmem [shape: bf16[64,4], index: 5, kind: input, shape index: {}]   ;;  %s312_s6 = inlined_call_operand.vmem [shape: f32[1,4], index: 6, kind: input, shape index: {}]   ;;  %s313_s7 = inlined_call_operand.vmem [shape: f32[8,4], index: 7, kind: output, shape index: {}]  }
   0x1   :  { %v212_v0 = vld [vmem:[%s306_s1] sm:$0xff]  ;;  %v216_v2 = vld [vmem:[%s308_s3 + $0x18] sm:$0xff]  ;;  %v215_v4 = vld [vmem:[%s308_s3 + $0x10] sm:$0xff] }
   0x2   :  { %v27_v1 = vld [vmem:[%s307_s0] sm:$0xff]  ;;  %52 = vmatpush.bf16.msra.mxu0 %v212_v0  ;;  %104 = vmatpush.bf16.msra.mxu1 %v216_v2  ;;  %v214_v5 = vld [vmem:[%s308_s3 + $0x8] sm:$0xff]  ;;  %v220_v7 = vld [vmem:[%s311_s5 + $0x18] sm:$0xff] }
   0x3   :  { %v28_v3 = vpack.c.bf16 %v27_v1, %v27_v1  ;;  %v213_v6 = vld [vmem:[%s308_s3] sm:$0xff]  ;;  %158 = vmatpush.bf16.msra.mxu2 %v220_v7  ;;  %v219_v8 = vld [vmem:[%s311_s5 + $0x10] sm:$0xff]  ;;  %v218_v15 = vld [vmem:[%s311_s5 + $0x8] sm:$0xff] }
   0x4   :  { %v221_v9 = vld [vmem:[%s309_s2] ss:$0 sm:$0xff] }
   0x5   :  { %177 = vmatmul.msk.bf16.vlgmr.msra.gmra.mxu0 %vm41_vm0, %v28_v3  ;;  %v217_v16 = vld [vmem:[%s311_s5] sm:$0xff] }
   0x6   :  { %105 = vmatpush.bf16.msra.mxu1 %v215_v4  ;;  %v222_v17 = vld [vmem:[%s310_s4] ss:$0 sm:$0xff] }
   0x7   :  { %159 = vmatpush.bf16.msra.mxu2 %v219_v8  ;;  %v223_v23 = vld [vmem:[%s312_s6] ss:$0 sm:$0xff] }
   0xa   :  { %106 = vmatpush.bf16.msra.mxu1 %v214_v5 }
   0xb   :  { %160 = vmatpush.bf16.msra.mxu2 %v218_v15 }
   0xe   :  { %107 = vmatpush.bf16.msra.mxu1 %v213_v6 }
   0xf   :  { %161 = vmatpush.bf16.msra.mxu2 %v217_v16 }
  0x82   :  { %v54_v10 = vpop.f32.mrf.mxu0 }
  0x83   :  { %v55_v11 = vadd.f32 %v221_v9, %v54_v10 }
  0x85   :  { %v58_v12 = vmax.f32 %v55_v11, 0.0 }
  0x87   :  { %v59_v13 = vpack.c.bf16 %v58_v12, %v58_v12 }
  0x89   :  { %194 = vmatmul.msk.bf16.vlgmr.msra.gmra.mxu1 %vm96_vm1, %v59_v13 }
  0x8a   :  { %v56_v14 = vpop.f32.mrf.mxu0 }
 0x106   :  { %v109_v18 = vpop.f32.mrf.mxu1 }
 0x107   :  { %v110_v19 = vadd.f32 %v222_v17, %v109_v18 }
 0x109   :  { %v113_v20 = vmax.f32 %v110_v19, 0.0 }
 0x10b   :  { %v114_v21 = vpack.c.bf16 %v113_v20, %v113_v20 }
 0x10d   :  { %211 = vmatmul.msk.bf16.vlgmr.msra.gmra.mxu2 %vm96_vm1, %v114_v21 }
 0x10e   :  { %v111_v22 = vpop.f32.mrf.mxu1 }
 0x190   :  { %v163_v24 = vpop.f32.mrf.mxu2 }
 0x191   :  { %v164_v25 = vadd.f32 %v223_v23, %v163_v24 }
 0x193   :  { %168 = vst.msk [vmem:[%s313_s7] sm:$0xff] %vm167_vm2, %v164_v25 }
 0x198   :  { %v165_v26 = vpop.f32.mrf.mxu2 }

</bundles_post_ra>
